<compile_context>
chip_gen: v7x
topology: tpu7x:2x2x1
jax: 0.10.0
libtpu: 0.0.40
codegen_flags: <defaults>
</compile_context>

<pallas_src>
import jax
import jax.numpy as jnp
from jax.experimental import pallas as pl
from jax.experimental.pallas import tpu as pltpu


# --------------------------------------------------------------------------- #
# helpers
# --------------------------------------------------------------------------- #
def _round_up(x, m):
    return ((x + m - 1) // m) * m


def _vmem_capacity_bytes():
    try:
        return int(pltpu.get_tpu_info().vmem_capacity_bytes)
    except Exception:
        return 64 << 20  # conservative fallback (v7x physical VMEM)


def _pick_tile_bus(n, budget_bytes):
    """Bus-axis tile: full n if the four (n,n) f32 weights fit (double-buffered)
    in half the budget, otherwise the largest 128-multiple divisor that fits."""
    full = 2 * 4 * n * n * 4
    if full <= budget_bytes // 2 or n % 128 != 0:
        return n
    nt = n // 128
    for parts in range(2, nt + 1):
        if nt % parts == 0 and 2 * 4 * n * (n // parts) * 4 <= budget_bytes // 2:
            return n // parts
    return 128


# --------------------------------------------------------------------------- #
# kernels
# --------------------------------------------------------------------------- #
def _core(u, w, uk, wk, g, b):
    """Stage 1 (four MXU dots against two resident RHS) + factored VPU core."""
    f32 = jnp.float32
    uG = jnp.dot(u, g, preferred_element_type=f32)
    wG = jnp.dot(w, g, preferred_element_type=f32)
    uB = jnp.dot(u, b, preferred_element_type=f32)
    wB = jnp.dot(w, b, preferred_element_type=f32)
    a = uG - wB
    c = wG + uB
    p_core = uk * a + wk * c
    q_core = wk * a - uk * c
    return p_core, q_core


def _kernel_single(u_ref, w_ref, g_ref, b_ref, wp_ref, wq_ref,
                   bp_ref, bq_ref, p_ref, q_ref):
    """Grid (batch,): all weights resident; two lane-dense (T, n) outputs."""
    u = u_ref[...]
    w = w_ref[...]
    pc, qc = _core(u, w, u, w, g_ref[...], b_ref[...])
    wdt = wp_ref.dtype
    p = jnp.dot(pc.astype(wdt), wp_ref[...], preferred_element_type=jnp.float32)
    q = jnp.dot(qc.astype(wdt), wq_ref[...], preferred_element_type=jnp.float32)
    p_ref[...] = (p + bp_ref[...]).astype(p_ref.dtype)
    q_ref[...] = (q + bq_ref[...]).astype(q_ref.dtype)


def _kernel_bus_tiled(u_ref, w_ref, ut_ref, wt_ref, g_ref, b_ref, wp_ref, wq_ref,
                      bp_ref, bq_ref, p_ref, q_ref, accp_ref, accq_ref):
    """Grid (batch, bus): bus axis is a stage-2 reduction ("arbitrary"),
    accumulated in f32 VMEM scratch and written back on the last bus tile."""
    k = pl.program_id(1)
    pc, qc = _core(u_ref[...], w_ref[...], ut_ref[...], wt_ref[...],
                   g_ref[...], b_ref[...])
    wdt = wp_ref.dtype
    dp = jnp.dot(pc.astype(wdt), wp_ref[...], preferred_element_type=jnp.float32)
    dq = jnp.dot(qc.astype(wdt), wq_ref[...], preferred_element_type=jnp.float32)

    @pl.when(k == 0)
    def _():
        accp_ref[...] = jnp.zeros_like(accp_ref)
        accq_ref[...] = jnp.zeros_like(accq_ref)

    accp_ref[...] += dp
    accq_ref[...] += dq

    @pl.when(k == pl.num_programs(1) - 1)
    def _():
        p_ref[...] = (accp_ref[...] + bp_ref[...]).astype(p_ref.dtype)
        q_ref[...] = (accq_ref[...] + bq_ref[...]).astype(q_ref.dtype)


# --------------------------------------------------------------------------- #
# parameter prep (one-time, offline)
# --------------------------------------------------------------------------- #
def prepare_params(params, compute_dtype=jnp.float32):
    """Fold Auw into G/B, transpose weights, fold pre-linear biases (exact)."""
    G, B, Auw = params["G"], params["B"], params["Auw"]
    Wp, bp = params["Wp"], params["bp"]
    Wq, bq = params["Wq"], params["bq"]
    bias_p, bias_q = params["bias_p"], params["bias_q"]
    n = G.shape[0]
    f32 = jnp.float32
    cd = jnp.dtype(compute_dtype)

    geff_t = (G * Auw).T.astype(f32)
    beff_t = (B * Auw).T.astype(f32)
    wp_t = Wp.T.astype(f32)
    wq_t = Wq.T.astype(f32)
    bp_eff = bias_p.reshape(1, n).astype(f32) @ wp_t + bp.reshape(1, n).astype(f32)
    bq_eff = bias_q.reshape(1, n).astype(f32) @ wq_t + bq.reshape(1, n).astype(f32)

    return {
        "geff_t": geff_t.astype(cd), "beff_t": beff_t.astype(cd),
        "wp_t": wp_t.astype(cd), "wq_t": wq_t.astype(cd),
        "bp_eff": bp_eff, "bq_eff": bq_eff,       # kept f32 (added post-accum)
        "n_bus": int(n), "compute_dtype": cd,
    }


# --------------------------------------------------------------------------- #
# forward
# --------------------------------------------------------------------------- #
def forward_xtx_topo(u, w, prepped, *, tile_batch=None, tile_bus=None):
    """Pallas equivalent of Forward_xTx_topo.forward(u, w) -> (p, q)."""
    n = prepped["n_bus"]
    cd = prepped["compute_dtype"]
    esz = jnp.dtype(cd).itemsize
    N = int(u.shape[0])
    assert u.shape == (N, n) and w.shape == (N, n)
    u = u.astype(cd)
    w = w.astype(cd)

    cap = _vmem_capacity_bytes()
    budget = (cap * 3) // 4  # never above 75% of physical VMEM (48 MiB on v7x)

    # ---- batch tiling: >=2 grid steps when possible (v7x has 2 TensorCores) ----
    if tile_batch is None:
        tile_batch = min(512, max(8, _round_up((N + 1) // 2, 8)))
    tile_batch = int(max(8, _round_up(min(int(tile_batch), max(N, 8)), 8)))
    gb = pl.cdiv(N, tile_batch)           # ragged last block handled by Pallas

    # ---- bus tiling (only needed when resident weights would not fit VMEM) ----
    if tile_bus is None:
        tile_bus = _pick_tile_bus(n, budget)
    tile_bus = int(tile_bus)
    if tile_bus != n:
        assert n % tile_bus == 0 and tile_bus % 128 == 0, \
            "tile_bus must divide n_bus and be a multiple of 128"
    kb = n // tile_bus
    multi = kb > 1

    out_shape = (jax.ShapeDtypeStruct((N, n), jnp.float32),
                 jax.ShapeDtypeStruct((N, n), jnp.float32))
    out_specs = [pl.BlockSpec((tile_batch, n), (lambda i, k: (i, 0)) if multi
                              else (lambda i: (i, 0)))] * 2

    if multi:
        grid = (gb, kb)
        in_specs = [
            pl.BlockSpec((tile_batch, n), lambda i, k: (i, 0)),         # u (full width)
            pl.BlockSpec((tile_batch, n), lambda i, k: (i, 0)),         # w (full width)
            pl.BlockSpec((tile_batch, tile_bus), lambda i, k: (i, k)),  # u bus-tile cols
            pl.BlockSpec((tile_batch, tile_bus), lambda i, k: (i, k)),  # w bus-tile cols
            pl.BlockSpec((n, tile_bus), lambda i, k: (0, k)),           # Geff^T cols
            pl.BlockSpec((n, tile_bus), lambda i, k: (0, k)),           # Beff^T cols
            pl.BlockSpec((tile_bus, n), lambda i, k: (k, 0)),           # Wp^T rows
            pl.BlockSpec((tile_bus, n), lambda i, k: (k, 0)),           # Wq^T rows
            pl.BlockSpec((1, n), lambda i, k: (0, 0)),                  # bp_eff
            pl.BlockSpec((1, n), lambda i, k: (0, 0)),                  # bq_eff
        ]
        scratch = [pltpu.VMEM((tile_batch, n), jnp.float32),
                   pltpu.VMEM((tile_batch, n), jnp.float32)]
        args = (u, w, u, w, prepped["geff_t"], prepped["beff_t"],
                prepped["wp_t"], prepped["wq_t"], prepped["bp_eff"], prepped["bq_eff"])
        kernel = _kernel_bus_tiled
        semantics = ("parallel", "arbitrary")
        need = (2 * 2 * tile_batch * n * esz          # u, w full (double-buffered)
                + 2 * 2 * tile_batch * tile_bus * esz  # u, w bus tiles
                + 2 * 4 * n * tile_bus * esz           # weight blocks
                + 2 * 2 * tile_batch * n * 4           # outputs
                + 2 * tile_batch * n * 4               # accumulators
                + 8 * tile_batch * tile_bus * 4        # in-kernel temporaries
                + 4 * n * 4)
    else:
        grid = (gb,)
        in_specs = [
            pl.BlockSpec((tile_batch, n), lambda i: (i, 0)),            # u
            pl.BlockSpec((tile_batch, n), lambda i: (i, 0)),            # w
            pl.BlockSpec((n, n), lambda i: (0, 0)),                     # Geff^T
            pl.BlockSpec((n, n), lambda i: (0, 0)),                     # Beff^T
            pl.BlockSpec((n, n), lambda i: (0, 0)),                     # Wp^T
            pl.BlockSpec((n, n), lambda i: (0, 0)),                     # Wq^T
            pl.BlockSpec((1, n), lambda i: (0, 0)),                     # bp_eff
            pl.BlockSpec((1, n), lambda i: (0, 0)),                     # bq_eff
        ]
        scratch = []
        args = (u, w, prepped["geff_t"], prepped["beff_t"],
                prepped["wp_t"], prepped["wq_t"], prepped["bp_eff"], prepped["bq_eff"])
        kernel = _kernel_single
        semantics = ("parallel",)
        need = (2 * 2 * tile_batch * n * esz           # u, w (double-buffered)
                + 2 * 4 * n * n * esz                   # weights
                + 2 * 2 * tile_batch * n * 4            # outputs
                + 8 * tile_batch * n * 4                # in-kernel temporaries
                + 4 * n * 4)

    vmem_limit = int(min(max(2 * need + (1 << 20), 32 << 20), budget))

    flops = 12 * N * n * n + 8 * N * n
    bytes_accessed = (2 * N * n * esz
                      + (2 * N * n * esz if multi else 0)
                      + 2 * N * n * 4
                      + 4 * n * n * esz * (gb if multi else 1)
                      + 4 * n * 4)
    cost = pl.CostEstimate(flops=int(flops), transcendentals=0,
                           bytes_accessed=int(bytes_accessed))

    p, q = pl.pallas_call(
        kernel,
        out_shape=out_shape,
        grid_spec=pltpu.PrefetchScalarGridSpec(
            num_scalar_prefetch=0,
            grid=grid,
            in_specs=in_specs,
            out_specs=out_specs,
            scratch_shapes=scratch,
        ),
        compiler_params=pltpu.CompilerParams(
            dimension_semantics=semantics,
            vmem_limit_bytes=vmem_limit),
        cost_estimate=cost,
    )(*args)
    return p, q


# --------------------------------------------------------------------------- #
# pure-JAX reference (mirrors the original torch outer-product code)
# --------------------------------------------------------------------------- #
def _reference(u, w, params):
    G, B, Auw = params["G"], params["B"], params["Auw"]
    u1 = u[:, None, :]
    ut = u[:, :, None]
    w1 = w[:, None, :]
    wt = w[:, :, None]
    wiwk = wt * w1
    uiuk = ut * u1
    wiuk = wt * u1
    uiwk = ut * w1
    p = (((uiuk + wiwk) * G + (wiuk - uiwk) * B) * Auw).sum(2)
    q = (((wiuk - uiwk) * G - (uiuk + wiwk) * B) * Auw).sum(2)
    p = p + params["bias_p"]
    q = q + params["bias_q"]
    p = p @ params["Wp"].T + params["bp"]
    q = q @ params["Wq"].T + params["bq"]
    return p, q


def _make_params(n_bus, key):
    keys = jax.random.split(key, 11)
    adj = (jax.random.uniform(keys[0], (n_bus, n_bus)) < 0.2).astype(jnp.float32)
    Auw = jnp.clip(adj + adj.T + jnp.eye(n_bus, dtype=jnp.float32), 0.0, 1.0)
    inv = 1.0 / jnp.sqrt(n_bus)
    params = {
        "Auw": Auw,
        "G": jax.random.uniform(keys[1], (n_bus, n_bus), jnp.float32) * Auw,
        "B": jax.random.uniform(keys[2], (n_bus, n_bus), jnp.float32) * Auw,
        "bias_p": jax.random.uniform(keys[3], (1, n_bus), jnp.float32),
        "bias_q": jax.random.uniform(keys[4], (1, n_bus), jnp.float32),
        "Wp": jax.random.uniform(keys[5], (n_bus, n_bus), jnp.float32,
                                 minval=-1.0, maxval=1.0) * inv,
        "bp": jax.random.uniform(keys[6], (n_bus,), jnp.float32,
                                 minval=-1.0, maxval=1.0) * inv,
        "Wq": jax.random.uniform(keys[7], (n_bus, n_bus), jnp.float32,
                                 minval=-1.0, maxval=1.0) * inv,
        "bq": jax.random.uniform(keys[8], (n_bus,), jnp.float32,
                                 minval=-1.0, maxval=1.0) * inv,
    }
    return params, keys[9], keys[10]


if __name__ == "__main__":
    def run_case(n_bus, batch, tile_batch, tile_bus):
        key = jax.random.PRNGKey(0)
        params, ku, kw = _make_params(n_bus, key)
        u = jax.random.normal(ku, (batch, n_bus), jnp.float32)
        w = jax.random.normal(kw, (batch, n_bus), jnp.float32)
        prepped = prepare_params(params)            # one-time parameter prep
        p, q = forward_xtx_topo(u, w, prepped, tile_batch=tile_batch, tile_bus=tile_bus)
        jax.block_until_ready((p, q))
        p_ref, q_ref = _reference(u, w, params)
        assert p.shape == (batch, n_bus) and q.shape == (batch, n_bus)
        assert jnp.allclose(p, p_ref, atol=2e-3, rtol=2e-3), \
            float(jnp.max(jnp.abs(p - p_ref)))
        assert jnp.allclose(q, q_ref, atol=2e-3, rtol=2e-3), \
            float(jnp.max(jnp.abs(q - q_ref)))

    # Case 1: resident-weight path; batch 120 -> two tiles of 64 (ragged last
    # block, no wrapper padding), >=2 grid steps for v7x megacore sharding.
    run_case(n_bus=128, batch=120, tile_batch=None, tile_bus=None)

    # Case 2: bus-tiled path (2 bus tiles of 128) exercising the "arbitrary"
    # reduction axis and the f32 stage-2 accumulator.
    run_case(n_bus=256, batch=48, tile_batch=16, tile_bus=128)

    print("KERNEL_OK")
</pallas_src>

<mosaic_0001>
module attributes {stable_mosaic.version = 11 : i64} {
  func.func @_kernel_single(%arg0: i32, %arg1: memref<64x128xf32, #tpu.memory_space<vmem>>, %arg2: memref<64x128xf32, #tpu.memory_space<vmem>>, %arg3: memref<128x128xf32, #tpu.memory_space<vmem>>, %arg4: memref<128x128xf32, #tpu.memory_space<vmem>>, %arg5: memref<128x128xf32, #tpu.memory_space<vmem>>, %arg6: memref<128x128xf32, #tpu.memory_space<vmem>>, %arg7: memref<1x128xf32, #tpu.memory_space<vmem>>, %arg8: memref<1x128xf32, #tpu.memory_space<vmem>>, %arg9: memref<64x128xf32, #tpu.memory_space<vmem>>, %arg10: memref<64x128xf32, #tpu.memory_space<vmem>>) attributes {dimension_semantics = [#tpu.dimension_semantics<parallel>], iteration_bounds = array<i64: 2>, scalar_prefetch = 0 : i64, scratch_operands = 0 : i64, tpu.core_type = #tpu.core_type<tc>, window_params = [{transform_indices = @transform_0, window_bounds = array<i64: 64, 128>}, {transform_indices = @transform_1, window_bounds = array<i64: 64, 128>}, {pipeline_mode = #tpu.pipeline_mode<synchronous>, transform_indices = @transform_2, window_bounds = array<i64: 128, 128>}, {pipeline_mode = #tpu.pipeline_mode<synchronous>, transform_indices = @transform_3, window_bounds = array<i64: 128, 128>}, {pipeline_mode = #tpu.pipeline_mode<synchronous>, transform_indices = @transform_4, window_bounds = array<i64: 128, 128>}, {pipeline_mode = #tpu.pipeline_mode<synchronous>, transform_indices = @transform_5, window_bounds = array<i64: 128, 128>}, {pipeline_mode = #tpu.pipeline_mode<synchronous>, transform_indices = @transform_6, window_bounds = array<i64: 1, 128>}, {pipeline_mode = #tpu.pipeline_mode<synchronous>, transform_indices = @transform_7, window_bounds = array<i64: 1, 128>}, {transform_indices = @transform_8, window_bounds = array<i64: 64, 128>}, {transform_indices = @transform_9, window_bounds = array<i64: 64, 128>}]} {
    %c0 = arith.constant 0 : index
    %c0_0 = arith.constant 0 : index
    %0 = vector.load %arg1[%c0, %c0_0] : memref<64x128xf32, #tpu.memory_space<vmem>>, vector<64x128xf32>
    %c0_1 = arith.constant 0 : index
    %c0_2 = arith.constant 0 : index
    %1 = vector.load %arg2[%c0_1, %c0_2] : memref<64x128xf32, #tpu.memory_space<vmem>>, vector<64x128xf32>
    %c0_3 = arith.constant 0 : index
    %c0_4 = arith.constant 0 : index
    %2 = vector.load %arg3[%c0_3, %c0_4] : memref<128x128xf32, #tpu.memory_space<vmem>>, vector<128x128xf32>
    %c0_5 = arith.constant 0 : index
    %c0_6 = arith.constant 0 : index
    %3 = vector.load %arg4[%c0_5, %c0_6] : memref<128x128xf32, #tpu.memory_space<vmem>>, vector<128x128xf32>
    %cst = arith.constant dense<0.000000e+00> : vector<64x128xf32>
    %4 = tpu.matmul %0, %2, %cst {dimension_numbers = #tpu.dot_dimension_numbers<[1], [0], [0], [1], [0, 0, 1, 1], [], []>} : vector<64x128xf32>, vector<128x128xf32>, vector<64x128xf32> -> vector<64x128xf32>
    %cst_7 = arith.constant dense<0.000000e+00> : vector<64x128xf32>
    %5 = tpu.matmul %1, %2, %cst_7 {dimension_numbers = #tpu.dot_dimension_numbers<[1], [0], [0], [1], [0, 0, 1, 1], [], []>} : vector<64x128xf32>, vector<128x128xf32>, vector<64x128xf32> -> vector<64x128xf32>
    %cst_8 = arith.constant dense<0.000000e+00> : vector<64x128xf32>
    %6 = tpu.matmul %0, %3, %cst_8 {dimension_numbers = #tpu.dot_dimension_numbers<[1], [0], [0], [1], [0, 0, 1, 1], [], []>} : vector<64x128xf32>, vector<128x128xf32>, vector<64x128xf32> -> vector<64x128xf32>
    %cst_9 = arith.constant dense<0.000000e+00> : vector<64x128xf32>
    %7 = tpu.matmul %1, %3, %cst_9 {dimension_numbers = #tpu.dot_dimension_numbers<[1], [0], [0], [1], [0, 0, 1, 1], [], []>} : vector<64x128xf32>, vector<128x128xf32>, vector<64x128xf32> -> vector<64x128xf32>
    %8 = arith.subf %4, %7 : vector<64x128xf32>
    %9 = arith.addf %5, %6 : vector<64x128xf32>
    %10 = arith.mulf %0, %8 : vector<64x128xf32>
    %11 = arith.mulf %1, %9 : vector<64x128xf32>
    %12 = arith.addf %10, %11 : vector<64x128xf32>
    %13 = arith.mulf %1, %8 : vector<64x128xf32>
    %14 = arith.mulf %0, %9 : vector<64x128xf32>
    %15 = arith.subf %13, %14 : vector<64x128xf32>
    %c0_10 = arith.constant 0 : index
    %c0_11 = arith.constant 0 : index
    %16 = vector.load %arg5[%c0_10, %c0_11] : memref<128x128xf32, #tpu.memory_space<vmem>>, vector<128x128xf32>
    %cst_12 = arith.constant dense<0.000000e+00> : vector<64x128xf32>
    %17 = tpu.matmul %12, %16, %cst_12 {dimension_numbers = #tpu.dot_dimension_numbers<[1], [0], [0], [1], [0, 0, 1, 1], [], []>} : vector<64x128xf32>, vector<128x128xf32>, vector<64x128xf32> -> vector<64x128xf32>
    %c0_13 = arith.constant 0 : index
    %c0_14 = arith.constant 0 : index
    %18 = vector.load %arg6[%c0_13, %c0_14] : memref<128x128xf32, #tpu.memory_space<vmem>>, vector<128x128xf32>
    %cst_15 = arith.constant dense<0.000000e+00> : vector<64x128xf32>
    %19 = tpu.matmul %15, %18, %cst_15 {dimension_numbers = #tpu.dot_dimension_numbers<[1], [0], [0], [1], [0, 0, 1, 1], [], []>} : vector<64x128xf32>, vector<128x128xf32>, vector<64x128xf32> -> vector<64x128xf32>
    %c0_16 = arith.constant 0 : index
    %c0_17 = arith.constant 0 : index
    %20 = vector.load %arg7[%c0_16, %c0_17] : memref<1x128xf32, #tpu.memory_space<vmem>>, vector<1x128xf32>
    %21 = vector.broadcast %20 : vector<1x128xf32> to vector<64x128xf32>
    %22 = arith.addf %17, %21 : vector<64x128xf32>
    %c0_18 = arith.constant 0 : index
    %c0_19 = arith.constant 0 : index
    %23 = vector.load %arg9[%c0_18, %c0_19] : memref<64x128xf32, #tpu.memory_space<vmem>>, vector<64x128xf32>
    tpu.vector_store %arg9[%c0_18, %c0_19], %22 {strides = array<i32>} : memref<64x128xf32, #tpu.memory_space<vmem>>, vector<64x128xf32>,
    %c0_20 = arith.constant 0 : index
    %c0_21 = arith.constant 0 : index
    %24 = vector.load %arg8[%c0_20, %c0_21] : memref<1x128xf32, #tpu.memory_space<vmem>>, vector<1x128xf32>
    %25 = vector.broadcast %24 : vector<1x128xf32> to vector<64x128xf32>
    %26 = arith.addf %19, %25 : vector<64x128xf32>
    %c0_22 = arith.constant 0 : index
    %c0_23 = arith.constant 0 : index
    %27 = vector.load %arg10[%c0_22, %c0_23] : memref<64x128xf32, #tpu.memory_space<vmem>>, vector<64x128xf32>
    tpu.vector_store %arg10[%c0_22, %c0_23], %26 {strides = array<i32>} : memref<64x128xf32, #tpu.memory_space<vmem>>, vector<64x128xf32>,
    return
  }
  func.func @transform_0(%arg0: i32) -> (i32, i32) {
    %c0_i32 = arith.constant 0 : i32
    %c0_i32_0 = arith.constant 0 : i32
    return %arg0, %c0_i32 : i32, i32
  }
  func.func @transform_1(%arg0: i32) -> (i32, i32) {
    %c0_i32 = arith.constant 0 : i32
    %c0_i32_0 = arith.constant 0 : i32
    return %arg0, %c0_i32 : i32, i32
  }
  func.func @transform_2(%arg0: i32) -> (i32, i32) {
    %c0_i32 = arith.constant 0 : i32
    %c0_i32_0 = arith.constant 0 : i32
    %c0_i32_1 = arith.constant 0 : i32
    return %c0_i32, %c0_i32_0 : i32, i32
  }
  func.func @transform_3(%arg0: i32) -> (i32, i32) {
    %c0_i32 = arith.constant 0 : i32
    %c0_i32_0 = arith.constant 0 : i32
    %c0_i32_1 = arith.constant 0 : i32
    return %c0_i32, %c0_i32_0 : i32, i32
  }
  func.func @transform_4(%arg0: i32) -> (i32, i32) {
    %c0_i32 = arith.constant 0 : i32
    %c0_i32_0 = arith.constant 0 : i32
    %c0_i32_1 = arith.constant 0 : i32
    return %c0_i32, %c0_i32_0 : i32, i32
  }
  func.func @transform_5(%arg0: i32) -> (i32, i32) {
    %c0_i32 = arith.constant 0 : i32
    %c0_i32_0 = arith.constant 0 : i32
    %c0_i32_1 = arith.constant 0 : i32
    return %c0_i32, %c0_i32_0 : i32, i32
  }
  func.func @transform_6(%arg0: i32) -> (i32, i32) {
    %c0_i32 = arith.constant 0 : i32
    %c0_i32_0 = arith.constant 0 : i32
    %c0_i32_1 = arith.constant 0 : i32
    return %c0_i32, %c0_i32_0 : i32, i32
  }
  func.func @transform_7(%arg0: i32) -> (i32, i32) {
    %c0_i32 = arith.constant 0 : i32
    %c0_i32_0 = arith.constant 0 : i32
    %c0_i32_1 = arith.constant 0 : i32
    return %c0_i32, %c0_i32_0 : i32, i32
  }
  func.func @transform_8(%arg0: i32) -> (i32, i32) {
    %c0_i32 = arith.constant 0 : i32
    %c0_i32_0 = arith.constant 0 : i32
    return %arg0, %c0_i32 : i32, i32
  }
  func.func @transform_9(%arg0: i32) -> (i32, i32) {
    %c0_i32 = arith.constant 0 : i32
    %c0_i32_0 = arith.constant 0 : i32
    return %arg0, %c0_i32 : i32, i32
  }
}

</mosaic_0001>

<bundles_post_ra>
// kernel: tpu_custom_call.1
= control target key start
LH: loop header
LB: loop body
LE: loop exit
PB: predicated region body
PF: predicated region fallthrough
CT: control target
= control target key end

     0   :  { %s3246_s0 = inlined_call_operand.hbm [shape: f32[120,128], index: 0, kind: input, shape index: {}]   ;;  %s3247_s1 = inlined_call_operand.hbm [shape: f32[120,128], index: 1, kind: input, shape index: {}]   ;;  %s3248_s2 = inlined_call_operand.hbm [shape: f32[128,128], index: 2, kind: input, shape index: {}]   ;;  %s3249_s3 = inlined_call_operand.hbm [shape: f32[128,128], index: 3, kind: input, shape index: {}]   ;;  %s3250_s4 = inlined_call_operand.hbm [shape: f32[128,128], index: 4, kind: input, shape index: {}]   ;;  %s3251_s5 = inlined_call_operand.hbm [shape: f32[128,128], index: 5, kind: input, shape index: {}]   ;;  %s3252_s6 = inlined_call_operand.vmem [shape: f32[1,128], index: 6, kind: input, shape index: {}]   ;;  %s3253_s7 = inlined_call_operand.vmem [shape: f32[1,128], index: 7, kind: input, shape index: {}]   ;;  %s3254_s8 = inlined_call_operand.hbm [shape: f32[120,128], index: 8, kind: output, shape index: {0}]   ;;  %s3255_s9 = inlined_call_operand.hbm [shape: f32[120,128], index: 9, kind: output, shape index: {1}]  }
   0x1   :  { %3266 = sst [smem:[#allocation28_spill]] %s3249_s3 }
   0x2   :  { %3267 = sst [smem:[#allocation29_spill]] %s3254_s8 }
   0x3   :  { %3268 = sst [smem:[#allocation30_spill]] %s3255_s9 }
   0x4   :  { %15 = vsyncpa [#allocation3], 0 }
   0x5   :  { %17 = vsyncpa [#allocation3 + $0x1], 0 }
   0x6   :  { %18 = vsyncpa [#allocation6], 0 }
   0x7   :  { %20 = vsyncpa [#allocation6 + $0x1], 0 }
   0x8   :  { %21 = vsyncpa [#allocation9], 0 }
   0x9   :  { %22 = vsyncpa [#allocation12], 0 }
   0xa   :  { %23 = vsyncpa [#allocation4], 0 }
   0xb   :  { %25 = vsyncpa [#allocation4 + $0x1], 0 }
   0xc   :  { %26 = vsyncpa [#allocation15], 0 }
   0xd   :  { %28 = vsyncpa [#allocation15 + $0x1], 0  ;;  %s2608_s30 = smov 0   ;;  %s2610_s10 = smov 0  }
   0xe   :  { %s2612_s11 = smov 0   ;;  %s2614_s12 = smov 0  }
   0xf LB: > { %3269 = sst [smem:[#allocation23_spill]] %s2526_s30  ;;  %s2629_s13 = sadd.s32 4294967295, %s2538_s12   ;;  %s2538_s12 = sphi %s2614_s12, %s3301_s12   ;;  %s2534_s11 = sphi %s2612_s11, %s3305_s11   ;;  %s2530_s10 = sphi %s2610_s10, %s3304_s10   ;;  %s2526_s30 = sphi %s2608_s30, %s3303_s30  }
  0x10   : > { %s1501_s14 = sadd.s32 4294967294, %s2538_s12   ;;  %s2633_s15 = sadd.s32 1, %s2538_s12  }
  0x11   : > { %3270 = sst [smem:[#allocation24_spill]] %s2633_s15  ;;  %s41_s16 = sadd.s32 1, %s2534_s11 }
  0x12   : > { %s38_s17 = ssub.s32 %s2538_s12, %s2633_s15  ;;  %p48_p0 = scmp.ne.s32.totalorder %s2534_s11, %s2530_s10 }
  0x13   : > { %p39_p1 = scmp.eq.s32.totalorder %s38_s17, 0  ;;  %p49_p2 = scmp.eq.s32.totalorder %s2538_s12, 0 }
  0x14   : > { %p54_p3 = scmp.ne.s32.totalorder %s2530_s10, %s2526_s30  ;;  %p3258_p4 = scmp.eq.s32.totalorder %s2629_s13, 0 }
  0x15   : > { %s2645_s18 = scalar_select %p39_p1, %s2534_s11, %s41_s16  }
  0x16   : > { %p2647_p5 = por %p49_p2, %p48_p0  ;;  %p2653_p6 = por %p3258_p4, %p54_p3 }
  0x17   : > { %3271 = sst [smem:[#allocation25_spill]] %s2645_s18  ;;  %p230_p7 = scmp.eq.s32.totalorder %s2629_s13, 1 }
  0x18   : > { %s3272_s19 = scalar_select %p2647_p5, 1, 0 }
  0x19   : > { %s3273_s20 = scalar_select %p2653_p6, 1, 0 }
  0x1a   : > { %p236_p8 = scmp.eq.s32.totalorder %s1501_s14, 1  ;;  %p1502_p9 = scmp.ge.s32.totalorder %s2538_s12, 1 }
  0x1b   : > { %p269_p10 = scmp.lt.s32.totalorder %s2538_s12, 3  ;;  %p2660_p11 = por %p230_p7, %p48_p0 }
  0x1c   : > { %p2664_p12 = por %p236_p8, %p54_p3  ;;  %s2540_s24 = smov [#allocation8]  }
  0x1d   : > { %s3274_s21 = scalar_select %p2660_p11, 1, 0 }
  0x1e   : > { %s3276_s22 = scalar_select %p2664_p12, 1, 0 }
  0x1f   : > { %3275 = sst [smem:[#allocation26_spill]] %s3274_s21  ;;  %p2668_p13 = pnand %p1502_p9, %p269_p10 }
  0x20   : > { %3277 = sst [smem:[#allocation27_spill]] %s3276_s22  ;;  %s294_s25 = sshll.u32 %s2540_s24, 4  ;;  %s295_s25 = int_to_ptr.vmem [resolvable:$true] %s294_s25 }
  0x21   : > { %s3278_s23 = scalar_select %p2668_p13, 1, 0 }
  0x22   : > { %p2181_p1 = pneg %p2668_p13  ;;  %s2541_s27 = smov [#allocation7]  }
  0x23   : > { %s281_s28 = sshll.u32 %s2541_s27, 4  ;;  %s3280_s3 = sld [smem:[#allocation28_spill]]  ;;  %s2680_s28 = int_to_ptr.vmem [resolvable:$true] %s281_s28 }
  0x24   : > { %p2676_p2 = pnand %p2181_p1, %p3258_p4 }
  0x26   : > { %p2690_p3 = pneg %p2676_p2 }
  0x29   : > { %s2256_s16 = scalar_lea.hbm %s3280_s3, 2048 }
  0x2a   : > { %p2257_p0 = scmp.ne.s32.totalorder %s3280_s3, %s2256_s16  ;;  %p2263_p9 = scmp.lt.u32.totalorder %s2256_s16, %s3280_s3 }
  0x2c   : > { %p2259_p7 = pnand %p2690_p3, %p2257_p0 }
  0x2e   : > { %p2260_p8 = pneg %p2259_p7 }
  0x30   : > { %p2265_p10 = pnand %p2263_p9, %p2260_p8 }
  0x32   : > { %2268 = shalt.err (!%p2265_p10)
}
  0x33   : > { %s2269_s29 = scalar_lea.vmem %s295_s25, 2048  ;;  %p2277_p11 = scmp.lt.s32.totalorder %s295_s25, %s295_s25 }
  0x34   : > { %p2270_p1 = scmp.ne.s32.totalorder %s295_s25, %s2269_s29  ;;  %p2278_p6 = scmp.lt.s32.totalorder %s2269_s29, %s2269_s29 }
  0x36   : > { %p2272_p4 = pnand %p2270_p1, %p2690_p3  ;;  %p2279_p13 = por %p2278_p6, %p2277_p11 }
  0x38   : > { %p2273_p12 = pneg %p2272_p4 }
  0x3a   : > { %p2280_p5 = pnand %p2279_p13, %p2273_p12 }
  0x3c   : > { %2283 = shalt.err (!%p2280_p5)
}
  0x3d   : > { %s2542_s18 = smov 128   ;;  %s2543_s14 = smov 8  }
  0x3e   : > { %2187 = dma.hbm_to_vmem [thread:$0]  (!%p2676_p2), %s3280_s3, 2048, %s295_s25, [#allocation9], %s2542_s18, %s2542_s18, %s2543_s14  }
  0x3f   : > { %s2284_s22 = scalar_lea.hbm %s3248_s2, 2048 }
  0x40   : > { %p2285_p4 = scmp.ne.s32.totalorder %s3248_s2, %s2284_s22  ;;  %p2291_p11 = scmp.lt.u32.totalorder %s2284_s22, %s3248_s2 }
  0x42   : > { %p2287_p5 = pnand %p2285_p4, %p2690_p3 }
  0x44   : > { %p2288_p6 = pneg %p2287_p5 }
  0x46   : > { %p2293_p12 = pnand %p2291_p11, %p2288_p6 }
  0x48   : > { %2296 = shalt.err (!%p2293_p12)
}
  0x49   : > { %s2297_s25 = scalar_lea.vmem %s2680_s28, 2048  ;;  %p2305_p8 = scmp.lt.s32.totalorder %s2680_s28, %s2680_s28 }
  0x4a   : > { %p2298_p13 = scmp.ne.s32.totalorder %s2680_s28, %s2297_s25  ;;  %p2306_p9 = scmp.lt.s32.totalorder %s2297_s25, %s2297_s25 }
  0x4c   : > { %p2300_p0 = pnand %p2298_p13, %p2690_p3  ;;  %p2307_p10 = por %p2306_p9, %p2305_p8 }
  0x4e   : > { %p2301_p7 = pneg %p2300_p0 }
  0x50   : > { %p2308_p1 = pnand %p2307_p10, %p2301_p7 }
  0x52   : > { %2311 = shalt.err (!%p2308_p1)
}
  0x53   : > { %2184 = dma.hbm_to_vmem [thread:$0]  (!%p2676_p2), %s3248_s2, 2048, %s2680_s28, [#allocation6], %s2542_s18, %s2542_s18, %s2543_s14  }
  0x54   : > { %s2544_s30 = smov [#allocation10]   ;;  %s2545_s15 = smov [#allocation11]  }
  0x55   : > { %s307_s22 = sshll.u32 %s2544_s30, 4  ;;  %s320_s16 = sshll.u32 %s2545_s15, 4  ;;  %s308_s22 = int_to_ptr.vmem [resolvable:$true] %s307_s22  ;;  %s321_s16 = int_to_ptr.vmem [resolvable:$true] %s320_s16 }
  0x56   : > { %s2312_s29 = scalar_lea.hbm %s3250_s4, 2048 }
  0x57   : > { %p2313_p4 = scmp.ne.s32.totalorder %s3250_s4, %s2312_s29  ;;  %p2319_p11 = scmp.lt.u32.totalorder %s2312_s29, %s3250_s4 }
  0x59   : > { %p2315_p5 = pnand %p2313_p4, %p2690_p3 }
  0x5b   : > { %p2316_p6 = pneg %p2315_p5 }
  0x5d   : > { %p2321_p12 = pnand %p2319_p11, %p2316_p6 }
  0x5f   : > { %2324 = shalt.err (!%p2321_p12)
}
  0x60   : > { %s2325_s28 = scalar_lea.vmem %s308_s22, 2048  ;;  %p2333_p8 = scmp.lt.s32.totalorder %s308_s22, %s308_s22 }
  0x61   : > { %p2326_p13 = scmp.ne.s32.totalorder %s308_s22, %s2325_s28  ;;  %p2334_p9 = scmp.lt.s32.totalorder %s2325_s28, %s2325_s28 }
  0x63   : > { %p2328_p0 = pnand %p2326_p13, %p2690_p3  ;;  %p2335_p10 = por %p2334_p9, %p2333_p8 }
  0x65   : > { %p2329_p7 = pneg %p2328_p0 }
  0x67   : > { %p2336_p1 = pnand %p2335_p10, %p2329_p7 }
  0x69   : > { %2339 = shalt.err (!%p2336_p1)
}
  0x6a   : > { %2190 = dma.hbm_to_vmem [thread:$0]  (!%p2676_p2), %s3250_s4, 2048, %s308_s22, [#allocation9], %s2542_s18, %s2542_s18, %s2543_s14  }
  0x6b   : > { %s2340_s15 = scalar_lea.hbm %s3251_s5, 2048 }
  0x6c   : > { %p2341_p4 = scmp.ne.s32.totalorder %s3251_s5, %s2340_s15  ;;  %p2347_p11 = scmp.lt.u32.totalorder %s2340_s15, %s3251_s5 }
  0x6e   : > { %p2343_p5 = pnand %p2341_p4, %p2690_p3 }
  0x70   : > { %p2344_p6 = pneg %p2343_p5 }
  0x72   : > { %p2349_p12 = pnand %p2347_p11, %p2344_p6 }
  0x74   : > { %2352 = shalt.err (!%p2349_p12)
}
  0x75   : > { %s2353_s8 = scalar_lea.vmem %s321_s16, 2048  ;;  %p2361_p8 = scmp.lt.s32.totalorder %s321_s16, %s321_s16 }
  0x76   : > { %p2354_p13 = scmp.ne.s32.totalorder %s321_s16, %s2353_s8  ;;  %p2362_p9 = scmp.lt.s32.totalorder %s2353_s8, %s2353_s8 }
  0x78   : > { %p2356_p0 = pnand %p2354_p13, %p2690_p3  ;;  %p2363_p10 = por %p2362_p9, %p2361_p8 }
  0x7a   : > { %p2357_p7 = pneg %p2356_p0 }
  0x7c   : > { %p2364_p1 = pnand %p2363_p10, %p2357_p7 }
  0x7e   : > { %2367 = shalt.err (!%p2364_p1)
}
  0x7f   : > { %2193 = dma.hbm_to_vmem [thread:$0]  (!%p2676_p2), %s3251_s5, 2048, %s321_s16, [#allocation12], %s2542_s18, %s2542_s18, %s2543_s14  }
  0x80   : > { %p1507_p4 = scmp.ge.s32.totalorder %s2538_s12, 2 }
  0x81   : > { %p3282_p3 = scmp.ne.s32.totalorder (!%p1507_p4), %s3272_s19, 0 }
  0x82   : > { %336 = sbr.rel (%p1507_p4) target bundleno = 209 (0xd1), region = 40 }
  0x89   : > { %339 = sbr.rel (!%p3282_p3) target bundleno = 172 (0xac), region = 44  ;;  %s340_s24 = sand.u32 (%p3282_p3), 1, %s2534_s11  }
  0x8a   : > { %s1509_s3 = sshll.u32 (%p3282_p3), %s2538_s12, 3  ;;  %s1508_s26 = sshll.u32 (%p3282_p3), %s340_s24, 6 }
  0x8b   : > { %s346_s21 = ssub.s32 (%p3282_p3), 15, %s1509_s3  ;;  %s2787_s14 = scalar_lea.sflag (%p3282_p3), [#allocation3], %s340_s24 }
  0x8c   : > { %p347_p5 = scmp.lt.s32.totalorder (%p3282_p3), %s346_s21, 8  ;;  %s344_s16 = scalar_lea.vmem (%p3282_p3), [#allocation2], %s1508_s26 }
  0x90   : > { %s3307_s21 = smov (!%p347_p5, %s346_s21), 8 }
  0x91   : > { %s2784_s9 = sshll.u32 %s3307_s21, 7 }
  0x92   : > { %s351_s18 = ssub.s32 1024, %s2784_s9 }
  0x93   : > { %352 = vsyncadd %s2787_s14, %s351_s18  ;;  %p1511_p2 = scmp.ne.s32.totalorder %s2784_s9, 0  ;;  %s1549_s30 = sshll.u32 %s2538_s12, 10 }
  0x94   : > { %s2795_s27 = scalar_lea.hbm %s3246_s0, %s1549_s30  ;;  %s357_s29 = sshll.u32 %s344_s16, 4  ;;  %s2797_s29 = int_to_ptr.vmem [resolvable:$true] %s357_s29 }
  0x95   : > { %s2368_s25 = scalar_lea.hbm %s2795_s27, %s2784_s9  ;;  %s2372_s28 = scalar_lea.hbm %s3246_s0, 1920 }
  0x96   : > { %p2369_p6 = scmp.ne.s32.totalorder %s2795_s27, %s2368_s25  ;;  %p2373_p13 = scmp.lt.u32.totalorder %s2795_s27, %s3246_s0 }
  0x97   : > { %p2374_p0 = scmp.lt.u32.totalorder %s2372_s28, %s2368_s25  ;;  %p2376_p8 = scmp.lt.u32.totalorder %s2368_s25, %s2795_s27 }
  0x98   : > { %p2370_p11 = pnand %p2369_p6, %p1511_p2 }
  0x99   : > { %p2375_p7 = por %p2374_p0, %p2373_p13 }
  0x9a   : > { %p2371_p12 = pneg %p2370_p11 }
  0x9b   : > { %p2377_p9 = por %p2376_p8, %p2375_p7 }
  0x9d   : > { %p2378_p10 = pnand %p2377_p9, %p2371_p12 }
  0x9f   : > { %2381 = shalt.err (!%p2378_p10)
}
  0xa0   : > { %s2382_s26 = scalar_lea.vmem %s2797_s29, %s2784_s9  ;;  %s2546_s21 = smov [#allocation2]  }
  0xa1   : > { %p2383_p1 = scmp.ne.s32.totalorder %s2797_s29, %s2382_s26  ;;  %s2386_s18 = sshll.u32 %s2546_s21, 4  ;;  %s2387_s18 = int_to_ptr.vmem [resolvable:$false] %s2386_s18 }
  0xa2   : > { %s2388_s16 = scalar_lea.vmem %s2387_s18, 2048  ;;  %p2389_p6 = scmp.lt.s32.totalorder %s2797_s29, %s2387_s18 }
  0xa3   : > { %p2384_p3 = pnand %p2383_p1, %p1511_p2  ;;  %p2390_p11 = scmp.lt.s32.totalorder %s2388_s16, %s2382_s26 }
  0xa5   : > { %p2385_p5 = pneg %p2384_p3  ;;  %p2391_p13 = por %p2390_p11, %p2389_p6 }
  0xa7   : > { %p2392_p0 = pnand %p2391_p13, %p2385_p5 }
  0xa9   : > { %2395 = shalt.err (!%p2392_p0)
}
  0xaa   : > { %s2547_s30 = smov 128   ;;  %s2548_s15 = smov 8  }
  0xab   : > { %363 = dma.hbm_to_vmem [thread:$0]  (%p1511_p2), %s2795_s27, %s2784_s9, %s2797_s29, %s2787_s14, %s2547_s30, %s2547_s30, %s2548_s15  }
  0xac PF: > { %p3283_p12 = scmp.ne.s32.totalorder %s3272_s19, 0 }
  0xad   : > { %s367_s17 = sand.u32 (%p3283_p12), 1, %s2538_s12   ;;  %s369_s25 = sand.u32 (%p3283_p12), 1, %s2534_s11  }
  0xae   : > { %366 = sbr.rel (!%p3283_p12) target bundleno = 209 (0xd1), region = 48  ;;  %s1515_s8 = sshll.u32 (%p3283_p12), %s369_s25, 6 }
  0xaf   : > { %s1516_s22 = sshll.u32 (%p3283_p12), %s2538_s12, 3  ;;  %s2832_s26 = scalar_lea.sflag (%p3283_p12), [#allocation6], %s367_s17 }
  0xb0   : > { %s373_s28 = ssub.s32 (%p3283_p12), 15, %s1516_s22  ;;  %s371_s9 = scalar_lea.vmem (%p3283_p12), [#allocation5], %s1515_s8 }
  0xb1   : > { %p374_p7 = scmp.lt.s32.totalorder (%p3283_p12), %s373_s28, 8 }
  0xb5   : > { %s3309_s28 = smov (!%p374_p7, %s373_s28), 8 }
  0xb6   : > { %s2829_s24 = sshll.u32 %s3309_s28, 7 }
  0xb7   : > { %s378_s3 = ssub.s32 1024, %s2829_s24 }
  0xb8   : > { %379 = vsyncadd %s2832_s26, %s378_s3  ;;  %p1518_p2 = scmp.ne.s32.totalorder %s2829_s24, 0  ;;  %s1550_s19 = sshll.u32 %s2538_s12, 10 }
  0xb9   : > { %s2840_s29 = scalar_lea.hbm %s3247_s1, %s1550_s19  ;;  %s384_s21 = sshll.u32 %s371_s9, 4  ;;  %s2842_s21 = int_to_ptr.vmem [resolvable:$true] %s384_s21 }
  0xba   : > { %s2396_s18 = scalar_lea.hbm %s2840_s29, %s2829_s24  ;;  %s2400_s15 = scalar_lea.hbm %s3247_s1, 1920 }
  0xbb   : > { %p2397_p8 = scmp.ne.s32.totalorder %s2840_s29, %s2396_s18  ;;  %p2401_p1 = scmp.lt.u32.totalorder %s2840_s29, %s3247_s1 }
  0xbc   : > { %p2402_p3 = scmp.lt.u32.totalorder %s2400_s15, %s2396_s18  ;;  %p2404_p6 = scmp.lt.u32.totalorder %s2396_s18, %s2840_s29 }
  0xbd   : > { %p2398_p9 = pnand %p2397_p8, %p1518_p2 }
  0xbe   : > { %p2403_p5 = por %p2402_p3, %p2401_p1 }
  0xbf   : > { %p2399_p10 = pneg %p2398_p9 }
  0xc0   : > { %p2405_p11 = por %p2404_p6, %p2403_p5 }
  0xc2   : > { %p2406_p13 = pnand %p2405_p11, %p2399_p10 }
  0xc4   : > { %2409 = shalt.err (!%p2406_p13)
}
  0xc5   : > { %s2410_s8 = scalar_lea.vmem %s2842_s21, %s2829_s24  ;;  %s2549_s22 = smov [#allocation5]  }
  0xc6   : > { %p2411_p0 = scmp.ne.s32.totalorder %s2842_s21, %s2410_s8  ;;  %s2414_s28 = sshll.u32 %s2549_s22, 4  ;;  %s2415_s28 = int_to_ptr.vmem [resolvable:$false] %s2414_s28 }
  0xc7   : > { %s2416_s3 = scalar_lea.vmem %s2415_s28, 2048  ;;  %p2417_p8 = scmp.lt.s32.totalorder %s2842_s21, %s2415_s28 }
  0xc8   : > { %p2412_p12 = pnand %p2411_p0, %p1518_p2  ;;  %p2418_p9 = scmp.lt.s32.totalorder %s2416_s3, %s2410_s8 }
  0xca   : > { %p2413_p7 = pneg %p2412_p12  ;;  %p2419_p1 = por %p2418_p9, %p2417_p8 }
  0xcc   : > { %p2420_p3 = pnand %p2419_p1, %p2413_p7 }
  0xce   : > { %2423 = shalt.err (!%p2420_p3)
}
  0xcf   : > { %s2550_s9 = smov 128   ;;  %s2551_s19 = smov 8  }
  0xd0   : > { %390 = dma.hbm_to_vmem [thread:$0]  (%p1518_p2), %s2840_s29, %s2829_s24, %s2842_s21, %s2832_s26, %s2550_s9, %s2550_s9, %s2551_s19  }
  0xd1 PF: > { %p3284_p10 = scmp.ne.s32.totalorder %s3278_s23, 0 }
  0xd2   : > { %s2872_s14 = sand.u32 (!%p3284_p10), 1, %s2530_s10   ;;  %p3285_p5 = scmp.ne.s32.totalorder (!%p3284_p10), %s3273_s20, 0 }
  0xd3   : > { %396 = sbr.rel (%p3284_p10) target bundleno = 821 (0x335), region = 52  ;;  %s2875_s27 = sshll.u32 (!%p3284_p10), %s2872_s14, 6 }
  0xd4   : > { %s399_s18 = scalar_lea.sflag (!%p3284_p10), [#allocation3], %s2872_s14  ;;  %s2879_s16 = scalar_lea.vmem (!%p3284_p10), [#allocation2], %s2875_s27 }
  0xda   : > { %2497 = dma.done.wait (%p3285_p5), %s399_s18, 1024  }
  0xdb   : > { %2499 = vsyncadd (%p3285_p5), %s399_s18, 4294966272  ;;  %s407_s23 = sand.u32 1, %s2629_s13   ;;  %s2887_s26 = scalar_lea.vmem [#allocation5], %s2875_s27 }
  0xdc   : > { %s408_s24 = scalar_lea.sflag [#allocation6], %s407_s23 }
  0xdd   : > { %2501 = dma.done.wait (%p3285_p5), %s408_s24, 1024  }
  0xde   : > { %2503 = vsyncadd (%p3285_p5), %s408_s24, 4294966272  ;;  %p3286_p2 = scmp.eq.s32.totalorder %s2629_s13, 0 }
  0xe0   : > { %2505 = dma.done.wait (%p3286_p2), [#allocation6], 2048   ;;  %p3287_p6 = pmov %p3286_p2 }
  0xe1   : > { %p3288_p11 = pmov %p3286_p2 }
  0xe2   : > { %2507 = vsyncadd (%p3287_p6), [#allocation6], 4294965248 }
  0xe3   : > { %2509 = dma.done.wait (%p3288_p11), [#allocation9], 4096   ;;  %p3289_p13 = pmov %p3286_p2 }
  0xe4   : > { %p3290_p0 = pmov %p3286_p2 }
  0xe5   : > { %2511 = vsyncadd (%p3289_p13), [#allocation9], 4294963200 }
  0xe6   : > { %2513 = dma.done.wait (%p3290_p0), [#allocation12], 2048   ;;  %p3291_p12 = pmov %p3290_p0 }
  0xe7   : > { %v508_v0 = vld [vmem:[#allocation7] sm:$0xff]  ;;  %v509_v1 = vld [vmem:[#allocation7 + $0x8] sm:$0xff]  ;;  %v510_v5 = vld [vmem:[#allocation7 + $0x10] sm:$0xff]  ;;  %s3117_s15 = scalar_lea.vmem [#allocation13], %s2875_s27  ;;  %s3121_s17 = scalar_lea.vmem [#allocation14], %s2875_s27 }
  0xe8   : > { %2515 = vsyncadd (%p3291_p12), [#allocation12], 4294965248  ;;  %v524_v2 = vld [vmem:[#allocation8] sm:$0xff]  ;;  %v2905_v3 = vpack.c.bf16 %v509_v1, %v508_v0  ;;  %v525_v4 = vld [vmem:[#allocation8 + $0x8] sm:$0xff]  ;;  %s1289_s25 = scalar_lea.sflag [#allocation4], %s2872_s14  ;;  %s1294_s8 = scalar_lea.sflag [#allocation15], %s2872_s14 }
  0xe9   : > { %v511_v6 = vld [vmem:[#allocation7 + $0x18] sm:$0xff]  ;;  %v2907_v7 = vpack.c.bf16 %v525_v4, %v524_v2  ;;  %v526_v9 = vld [vmem:[#allocation8 + $0x10] sm:$0xff]  ;;  %v512_v11 = vld [vmem:[#allocation7 + $0x20] sm:$0xff]  ;;  %s3292_s22 = sld [smem:[#allocation26_spill]] }
  0xea   : > { %v2909_v8 = vpack.c.bf16 %v511_v6, %v510_v5  ;;  %v527_v10 = vld [vmem:[#allocation8 + $0x18] sm:$0xff]  ;;  %1962 = vmatprep.subr.bf16.mxu0 %v2905_v3  ;;  %v513_v13 = vld [vmem:[#allocation7 + $0x28] sm:$0xff]  ;;  %v528_v14 = vld [vmem:[#allocation8 + $0x20] sm:$0xff] }
  0xeb   : > { %v2912_v12 = vpack.c.bf16 %v527_v10, %v526_v9  ;;  %v529_v15 = vld [vmem:[#allocation8 + $0x28] sm:$0xff]  ;;  %1994 = vmatprep.subr.bf16.mxu1 %v2907_v7  ;;  %1964 = vmatpush3.bf16.msra.mxu0 %v2905_v3  ;;  %v2918_v16 = vpack.c.bf16 %v513_v13, %v512_v11  ;;  %v514_v18 = vld [vmem:[#allocation7 + $0x30] sm:$0xff]  ;;  %v515_v19 = vld [vmem:[#allocation7 + $0x38] sm:$0xff] }
  0xec   : > { %1996 = vmatpush3.bf16.msra.mxu1 %v2907_v7  ;;  %1966 = vmatprep.subr.bf16.mxu0 %v2909_v8  ;;  %v2921_v17 = vpack.c.bf16 %v529_v15, %v528_v14  ;;  %v530_v20 = vld [vmem:[#allocation8 + $0x30] sm:$0xff]  ;;  %v531_v21 = vld [vmem:[#allocation8 + $0x38] sm:$0xff]  ;;  %v2926_v22 = vpack.c.bf16 %v515_v19, %v514_v18  ;;  %v516_v24 = vld [vmem:[#allocation7 + $0x40] sm:$0xff] }
  0xed   : > { %1998 = vmatprep.subr.bf16.mxu1 %v2912_v12  ;;  %v2929_v23 = vpack.c.bf16 %v531_v21, %v530_v20  ;;  %v517_v25 = vld [vmem:[#allocation7 + $0x48] sm:$0xff]  ;;  %v2932_v26 = vld [vmem:[%s2879_s16] sm:$0xff]  ;;  %v518_v31 = vld [vmem:[#allocation7 + $0x50] sm:$0xff] }
  0xee   : > { %v532_v27 = vld [vmem:[#allocation8 + $0x40] sm:$0xff]  ;;  %v533_v28 = vld [vmem:[#allocation8 + $0x48] sm:$0xff]  ;;  %1729 = vmatprep.mubr.f32.mxu0 %v2932_v26  ;;  %1773 = vmatprep.mubr.f32.mxu1 %v2932_v26  ;;  %v2939_v29 = vpack.c.bf16 %v517_v25, %v516_v24  ;;  %v519_v32 = vld [vmem:[#allocation7 + $0x58] sm:$0xff] }
  0xef   : > { %1968 = vmatpush3.bf16.msra.mxu0 %v2909_v8  ;;  %v2942_v30 = vpack.c.bf16 %v533_v28, %v532_v27  ;;  %v534_v33 = vld [vmem:[#allocation8 + $0x50] sm:$0xff]  ;;  %v535_v34 = vld [vmem:[#allocation8 + $0x58] sm:$0xff]  ;;  %v2947_v35 = vpack.c.bf16 %v519_v32, %v518_v31  ;;  %v520_v37 = vld [vmem:[#allocation7 + $0x60] sm:$0xff]  ;;  %p3293_p7 = scmp.ne.s32.totalorder %s3292_s22, 0 }
  0xf0   : > { %2000 = vmatpush3.bf16.msra.mxu1 %v2912_v12  ;;  %1970 = vmatprep.subr.bf16.mxu0 %v2918_v16  ;;  %v2950_v36 = vpack.c.bf16 %v535_v34, %v534_v33  ;;  %v521_v38 = vld [vmem:[#allocation7 + $0x68] sm:$0xff]  ;;  %v536_v39 = vld [vmem:[#allocation8 + $0x60] sm:$0xff]  ;;  %v522_v43 = vld [vmem:[#allocation7 + $0x70] sm:$0xff]  ;;  %s1535_s28 = sshll.u32 (%p3293_p7), %s2629_s13, 3 }
  0xf1   : > { %2002 = vmatprep.subr.bf16.mxu1 %v2921_v17  ;;  %v537_v40 = vld [vmem:[#allocation8 + $0x68] sm:$0xff]  ;;  %v2955_v41 = vpack.c.bf16 %v521_v38, %v520_v37  ;;  %v523_v44 = vld [vmem:[#allocation7 + $0x78] sm:$0xff]  ;;  %v538_v45 = vld [vmem:[#allocation8 + $0x70] sm:$0xff]  ;;  %s1302_s3 = ssub.s32 (%p3293_p7), 15, %s1535_s28 }
  0xf2   : > { %v2958_v42 = vpack.c.bf16 %v537_v40, %v536_v39  ;;  %v539_v46 = vld [vmem:[#allocation8 + $0x78] sm:$0xff]  ;;  %v2963_v47 = vpack.c.bf16 %v523_v44, %v522_v43  ;;  %v2971_v49 = vld [vmem:[%s2879_s16 + $0x8] sm:$0xff]  ;;  %v2977_v50 = vld [vmem:[%s2879_s16 + $0x10] sm:$0xff]  ;;  %p1303_p8 = scmp.lt.s32.totalorder (%p3293_p7), %s1302_s3, 8 }
  0xf3   : > { %1972 = vmatpush3.bf16.msra.mxu0 %v2918_v16  ;;  %v2021_v48 = vpack.c.bf16 %v539_v46, %v538_v45  ;;  %v2982_v51 = vld [vmem:[%s2879_s16 + $0x18] sm:$0xff]  ;;  %v2991_v52 = vld [vmem:[%s2879_s16 + $0x20] sm:$0xff]  ;;  %v2996_v53 = vld [vmem:[%s2879_s16 + $0x28] sm:$0xff] }
  0xf4   : > { %2004 = vmatpush3.bf16.msra.mxu1 %v2921_v17  ;;  %1974 = vmatprep.subr.bf16.mxu0 %v2926_v22  ;;  %v3005_v54 = vld [vmem:[%s2879_s16 + $0x30] sm:$0xff]  ;;  %v3010_v55 = vld [vmem:[%s2879_s16 + $0x38] sm:$0xff]  ;;  %v3019_v56 = vld [vmem:[%s2887_s26] sm:$0xff] }
  0xf5   : > { %2006 = vmatprep.subr.bf16.mxu1 %v2929_v23  ;;  %v3040_v57 = vld [vmem:[%s2887_s26 + $0x8] sm:$0xff]  ;;  %v3044_v58 = vld [vmem:[%s2887_s26 + $0x10] sm:$0xff]  ;;  %v3050_v59 = vld [vmem:[%s2887_s26 + $0x18] sm:$0xff] }
  0xf6   : > { %v3054_v60 = vld [vmem:[%s2887_s26 + $0x20] sm:$0xff]  ;;  %v3060_v61 = vld [vmem:[%s2887_s26 + $0x28] sm:$0xff]  ;;  %v3064_v62 = vld [vmem:[%s2887_s26 + $0x30] sm:$0xff] }
  0xf7   : > { %1976 = vmatpush3.bf16.msra.mxu0 %v2926_v22  ;;  %v3070_v63 = vld [vmem:[%s2887_s26 + $0x38] sm:$0xff]  ;;  %v1016_v0 = vld [vmem:[#allocation10] sm:$0xff]  ;;  %v1017_v1 = vld [vmem:[#allocation10 + $0x8] sm:$0xff] }
  0xf8   : > { %2008 = vmatpush3.bf16.msra.mxu1 %v2929_v23  ;;  %1978 = vmatprep.subr.bf16.mxu0 %v2939_v29  ;;  %v1032_v2 = vld [vmem:[#allocation11] sm:$0xff]  ;;  %v1033_v4 = vld [vmem:[#allocation11 + $0x8] sm:$0xff]  ;;  %v1018_v5 = vld [vmem:[#allocation10 + $0x10] sm:$0xff] }
  0xf9   : > { %2010 = vmatprep.subr.bf16.mxu1 %v2942_v30  ;;  %v1019_v6 = vld [vmem:[#allocation10 + $0x18] sm:$0xff]  ;;  %v1034_v9 = vld [vmem:[#allocation11 + $0x10] sm:$0xff]  ;;  %v1020_v11 = vld [vmem:[#allocation10 + $0x20] sm:$0xff] }
  0xfa   : > { %v1035_v10 = vld [vmem:[#allocation11 + $0x18] sm:$0xff]  ;;  %v1021_v13 = vld [vmem:[#allocation10 + $0x28] sm:$0xff]  ;;  %v1036_v14 = vld [vmem:[#allocation11 + $0x20] sm:$0xff] }
  0xfb   : > { %1980 = vmatpush3.bf16.msra.mxu0 %v2939_v29  ;;  %v1037_v15 = vld [vmem:[#allocation11 + $0x28] sm:$0xff]  ;;  %v1022_v18 = vld [vmem:[#allocation10 + $0x30] sm:$0xff]  ;;  %v1023_v19 = vld [vmem:[#allocation10 + $0x38] sm:$0xff] }
  0xfc   : > { %2012 = vmatpush3.bf16.msra.mxu1 %v2942_v30  ;;  %1982 = vmatprep.subr.bf16.mxu0 %v2947_v35  ;;  %v1038_v20 = vld [vmem:[#allocation11 + $0x30] sm:$0xff]  ;;  %v1039_v21 = vld [vmem:[#allocation11 + $0x38] sm:$0xff]  ;;  %v1024_v24 = vld [vmem:[#allocation10 + $0x40] sm:$0xff] }
  0xfd   : > { %2014 = vmatprep.subr.bf16.mxu1 %v2950_v36  ;;  %v1025_v25 = vld [vmem:[#allocation10 + $0x48] sm:$0xff]  ;;  %v1040_v27 = vld [vmem:[#allocation11 + $0x40] sm:$0xff]  ;;  %v1026_v31 = vld [vmem:[#allocation10 + $0x50] sm:$0xff] }
  0xfe   : > { %v1041_v28 = vld [vmem:[#allocation11 + $0x48] sm:$0xff]  ;;  %v1027_v32 = vld [vmem:[#allocation10 + $0x58] sm:$0xff]  ;;  %v1042_v33 = vld [vmem:[#allocation11 + $0x50] sm:$0xff] }
  0xff   : > { %1984 = vmatpush3.bf16.msra.mxu0 %v2947_v35  ;;  %v1043_v34 = vld [vmem:[#allocation11 + $0x58] sm:$0xff]  ;;  %v1028_v37 = vld [vmem:[#allocation10 + $0x60] sm:$0xff]  ;;  %v1029_v38 = vld [vmem:[#allocation10 + $0x68] sm:$0xff] }
 0x100   : > { %2016 = vmatpush3.bf16.msra.mxu1 %v2950_v36  ;;  %1986 = vmatprep.subr.bf16.mxu0 %v2955_v41  ;;  %v1044_v39 = vld [vmem:[#allocation11 + $0x60] sm:$0xff]  ;;  %v2113_v40 = vpack.c.bf16 %v1029_v38, %v1028_v37  ;;  %v1030_v43 = vld [vmem:[#allocation10 + $0x70] sm:$0xff]  ;;  %v1031_v44 = vld [vmem:[#allocation10 + $0x78] sm:$0xff] }
 0x101   : > { %2018 = vmatprep.subr.bf16.mxu1 %v2958_v42  ;;  %v1046_v45 = vld [vmem:[#allocation11 + $0x70] sm:$0xff]  ;;  %v2117_v46 = vpack.c.bf16 %v1031_v44, %v1030_v43 }
 0x103   : > { %1988 = vmatpush3.bf16.msra.mxu0 %v2955_v41 }
 0x104   : > { %2020 = vmatpush3.bf16.msra.mxu1 %v2958_v42  ;;  %1990 = vmatprep.subr.bf16.mxu0 %v2963_v47 }
 0x105   : > { %2022 = vmatprep.subr.bf16.mxu1 %v2021_v48 }
 0x107   : > { %1992 = vmatpush3.bf16.msra.mxu0 %v2963_v47 }
 0x108   : > { %2024 = vmatpush3.bf16.msra.mxu1 %v2021_v48  ;;  %2026 = vmatprep.subr.bf16.mxu0 %v2907_v7 }
 0x109   : > { %2058 = vmatprep.subr.bf16.mxu1 %v2905_v3 }
 0x10a   : > { %1730 = vmatmul.mubr.f32.vlgmr.msra.gmra.mrb[0].mxu0 %v2971_v49 }
 0x10b   : > { %1774 = vmatmul.mubr.f32.vlgmr.msra.gmra.mrb[0].mxu1 %v2971_v49  ;;  %2028 = vmatpush3.bf16.msra.mxu0 %v2907_v7  ;;  %v2121_v7 = vpack.c.bf16 %v1033_v4, %v1032_v2 }
 0x10c   : > { %2060 = vmatpush3.bf16.msra.mxu1 %v2905_v3  ;;  %2030 = vmatprep.subr.bf16.mxu0 %v2912_v12  ;;  %v2089_v3 = vpack.c.bf16 %v1017_v1, %v1016_v0 }
 0x10d   : > { %2062 = vmatprep.subr.bf16.mxu1 %v2909_v8  ;;  %1732 = vmatprep.mubr.f32.mxu0 %v2977_v50 }
 0x10e   : > { %1733 = vmatmul.mubr.f32.gmra.mrb[2].mxu0 %v2982_v51  ;;  %1776 = vmatprep.mubr.f32.mxu1 %v2977_v50 }
 0x10f   : > { %2032 = vmatpush3.bf16.msra.mxu0 %v2912_v12  ;;  %1777 = vmatmul.mubr.f32.gmra.mrb[2].mxu1 %v2982_v51  ;;  %v2125_v12 = vpack.c.bf16 %v1035_v10, %v1034_v9 }
 0x110   : > { %2064 = vmatpush3.bf16.msra.mxu1 %v2909_v8  ;;  %2034 = vmatprep.subr.bf16.mxu0 %v2921_v17  ;;  %v2093_v8 = vpack.c.bf16 %v1019_v6, %v1018_v5 }
 0x111   : > { %2066 = vmatprep.subr.bf16.mxu1 %v2918_v16  ;;  %1735 = vmatprep.mubr.f32.mxu0 %v2991_v52 }
 0x112   : > { %1736 = vmatmul.mubr.f32.gmra.mrb[4].mxu0 %v2996_v53  ;;  %1779 = vmatprep.mubr.f32.mxu1 %v2991_v52 }
 0x113   : > { %2036 = vmatpush3.bf16.msra.mxu0 %v2921_v17  ;;  %1780 = vmatmul.mubr.f32.gmra.mrb[4].mxu1 %v2996_v53  ;;  %v2129_v17 = vpack.c.bf16 %v1037_v15, %v1036_v14 }
 0x114   : > { %2068 = vmatpush3.bf16.msra.mxu1 %v2918_v16  ;;  %2038 = vmatprep.subr.bf16.mxu0 %v2929_v23  ;;  %v2097_v16 = vpack.c.bf16 %v1021_v13, %v1020_v11 }
 0x115   : > { %2070 = vmatprep.subr.bf16.mxu1 %v2926_v22  ;;  %1738 = vmatprep.mubr.f32.mxu0 %v3005_v54 }
 0x116   : > { %1739 = vmatmul.mubr.f32.gmra.mrb[6].mxu0 %v3010_v55  ;;  %1782 = vmatprep.mubr.f32.mxu1 %v3005_v54 }
 0x117   : > { %2040 = vmatpush3.bf16.msra.mxu0 %v2929_v23  ;;  %1783 = vmatmul.mubr.f32.gmra.mrb[6].mxu1 %v3010_v55  ;;  %v2133_v23 = vpack.c.bf16 %v1039_v21, %v1038_v20 }
 0x118   : > { %2072 = vmatpush3.bf16.msra.mxu1 %v2926_v22  ;;  %2042 = vmatprep.subr.bf16.mxu0 %v2942_v30  ;;  %v2101_v22 = vpack.c.bf16 %v1023_v19, %v1022_v18 }
 0x119   : > { %2074 = vmatprep.subr.bf16.mxu1 %v2939_v29  ;;  %1817 = vmatprep.mubr.f32.mxu0 %v3019_v56 }
 0x11a   : > { %1861 = vmatprep.mubr.f32.mxu1 %v3019_v56 }
 0x11b   : > { %2044 = vmatpush3.bf16.msra.mxu0 %v2942_v30  ;;  %v2137_v30 = vpack.c.bf16 %v1041_v28, %v1040_v27 }
 0x11c   : > { %2076 = vmatpush3.bf16.msra.mxu1 %v2939_v29  ;;  %2046 = vmatprep.subr.bf16.mxu0 %v2950_v36  ;;  %v2105_v29 = vpack.c.bf16 %v1025_v25, %v1024_v24 }
 0x11d   : > { %2078 = vmatprep.subr.bf16.mxu1 %v2947_v35 }
 0x11f   : > { %2048 = vmatpush3.bf16.msra.mxu0 %v2950_v36  ;;  %v2141_v36 = vpack.c.bf16 %v1043_v34, %v1042_v33 }
 0x120   : > { %2080 = vmatpush3.bf16.msra.mxu1 %v2947_v35  ;;  %2050 = vmatprep.subr.bf16.mxu0 %v2958_v42  ;;  %v2109_v35 = vpack.c.bf16 %v1027_v32, %v1026_v31 }
 0x121   : > { %2082 = vmatprep.subr.bf16.mxu1 %v2955_v41 }
 0x123   : > { %2052 = vmatpush3.bf16.msra.mxu0 %v2958_v42 }
 0x124   : > { %2084 = vmatpush3.bf16.msra.mxu1 %v2955_v41  ;;  %2054 = vmatprep.subr.bf16.mxu0 %v2021_v48  ;;  %v1045_v41 = vld [vmem:[#allocation11 + $0x68] sm:$0xff] }
 0x125   : > { %2086 = vmatprep.subr.bf16.mxu1 %v2963_v47  ;;  %v2145_v42 = vpack.c.bf16 %v1045_v41, %v1044_v39 }
 0x127   : > { %2056 = vmatpush3.bf16.msra.mxu0 %v2021_v48 }
 0x128   : > { %2088 = vmatpush3.bf16.msra.mxu1 %v2963_v47  ;;  %2090 = vmatprep.subr.bf16.mxu0 %v2089_v3  ;;  %v1047_v47 = vld [vmem:[#allocation11 + $0x78] sm:$0xff] }
 0x129   : > { %2122 = vmatprep.subr.bf16.mxu1 %v2121_v7  ;;  %v2149_v48 = vpack.c.bf16 %v1047_v47, %v1046_v45 }
 0x12a   : > { %1818 = vmatmul.mubr.f32.vlgmr.msra.gmra.mrb[8].mxu0 %v3040_v57 }
 0x12b   : > { %1862 = vmatmul.mubr.f32.vlgmr.msra.gmra.mrb[0].mxu1 %v3040_v57  ;;  %1820 = vmatprep.mubr.f32.mxu0 %v3044_v58 }
 0x12c   : > { %1864 = vmatprep.mubr.f32.mxu1 %v3044_v58  ;;  %2092 = vmatpush3.bf16.msra.mxu0 %v2089_v3 }
 0x12d   : > { %2124 = vmatpush3.bf16.msra.mxu1 %v2121_v7  ;;  %2094 = vmatprep.subr.bf16.mxu0 %v2093_v8 }
 0x12e   : > { %1821 = vmatmul.mubr.f32.gmra.mrb[10].mxu0 %v3050_v59  ;;  %2126 = vmatprep.subr.bf16.mxu1 %v2125_v12 }
 0x12f   : > { %1865 = vmatmul.mubr.f32.gmra.mrb[2].mxu1 %v3050_v59  ;;  %1823 = vmatprep.mubr.f32.mxu0 %v3054_v60 }
 0x130   : > { %1867 = vmatprep.mubr.f32.mxu1 %v3054_v60  ;;  %2096 = vmatpush3.bf16.msra.mxu0 %v2093_v8 }
 0x131   : > { %2128 = vmatpush3.bf16.msra.mxu1 %v2125_v12  ;;  %2098 = vmatprep.subr.bf16.mxu0 %v2097_v16 }
 0x132   : > { %1824 = vmatmul.mubr.f32.gmra.mrb[12].mxu0 %v3060_v61  ;;  %2130 = vmatprep.subr.bf16.mxu1 %v2129_v17 }
 0x133   : > { %1868 = vmatmul.mubr.f32.gmra.mrb[4].mxu1 %v3060_v61  ;;  %1826 = vmatprep.mubr.f32.mxu0 %v3064_v62 }
 0x134   : > { %1870 = vmatprep.mubr.f32.mxu1 %v3064_v62  ;;  %2100 = vmatpush3.bf16.msra.mxu0 %v2097_v16 }
 0x135   : > { %2132 = vmatpush3.bf16.msra.mxu1 %v2129_v17  ;;  %2102 = vmatprep.subr.bf16.mxu0 %v2101_v22 }
 0x136   : > { %1827 = vmatmul.mubr.f32.gmra.mrb[14].mxu0 %v3070_v63  ;;  %2134 = vmatprep.subr.bf16.mxu1 %v2133_v23 }
 0x137   : > { %1871 = vmatmul.mubr.f32.gmra.mrb[6].mxu1 %v3070_v63 }
 0x138   : > { %2104 = vmatpush3.bf16.msra.mxu0 %v2101_v22 }
 0x139   : > { %2136 = vmatpush3.bf16.msra.mxu1 %v2133_v23  ;;  %2106 = vmatprep.subr.bf16.mxu0 %v2105_v29 }
 0x13a   : > { %2138 = vmatprep.subr.bf16.mxu1 %v2137_v30 }
 0x13c   : > { %2108 = vmatpush3.bf16.msra.mxu0 %v2105_v29 }
 0x13d   : > { %2140 = vmatpush3.bf16.msra.mxu1 %v2137_v30  ;;  %2110 = vmatprep.subr.bf16.mxu0 %v2109_v35 }
 0x13e   : > { %2142 = vmatprep.subr.bf16.mxu1 %v2141_v36 }
 0x140   : > { %2112 = vmatpush3.bf16.msra.mxu0 %v2109_v35 }
 0x141   : > { %2144 = vmatpush3.bf16.msra.mxu1 %v2141_v36  ;;  %2114 = vmatprep.subr.bf16.mxu0 %v2113_v40 }
 0x142   : > { %2146 = vmatprep.subr.bf16.mxu1 %v2145_v42 }
 0x144   : > { %2116 = vmatpush3.bf16.msra.mxu0 %v2113_v40 }
 0x145   : > { %2148 = vmatpush3.bf16.msra.mxu1 %v2145_v42  ;;  %2118 = vmatprep.subr.bf16.mxu0 %v2117_v46 }
 0x146   : > { %2150 = vmatprep.subr.bf16.mxu1 %v2149_v48 }
 0x148   : > { %2120 = vmatpush3.bf16.msra.mxu0 %v2117_v46 }
 0x149   : > { %2152 = vmatpush3.bf16.msra.mxu1 %v2149_v48 }
 0x1dd   : > { %v1731_v0 = vpop.f32.mrb[0].mxu0 }
 0x1de   : > { %v606_v1 = vpop.f32.mrb[1].mxu0 }
 0x1e1   : > { %v1734_v2 = vpop.f32.mrb[2].mxu0 }
 0x1e2   : > { %v616_v3 = vpop.f32.mrb[3].mxu0 }
 0x1e5   : > { %v1737_v4 = vpop.f32.mrb[4].mxu0 }
 0x1e6   : > { %v626_v5 = vpop.f32.mrb[5].mxu0 }
 0x1e9   : > { %v1740_v6 = vpop.f32.mrb[6].mxu0 }
 0x1ea   : > { %v3075_v7 = vpop.f32.mrb[7].mxu0 }
 0x1fd   : > { %v1819_v8 = vpop.f32.mrb[8].mxu0 }
 0x1fe   : > { %v856_v9 = vsub.f32 %v1731_v0, %v1819_v8  ;;  %v1863_v10 = vpop.f32.mrb[0].mxu1  ;;  %v816_v11 = vpop.f32.mrb[9].mxu0 }
 0x1ff   : > { %v855_v12 = vsub.f32 %v606_v1, %v816_v11  ;;  %v929_v13 = vpop.f32.mrb[1].mxu1  ;;  %v977_v16 = vmul.f32 %v1863_v10, %v3040_v57  ;;  %v1001_v17 = vmul.f32 %v1863_v10, %v2971_v49 }
 0x200   : > { %v969_v14 = vmul.f32 %v856_v9, %v2971_v49  ;;  %v993_v15 = vmul.f32 %v856_v9, %v3040_v57  ;;  %v976_v20 = vmul.f32 %v929_v13, %v3019_v56  ;;  %v1000_v21 = vmul.f32 %v929_v13, %v2932_v26 }
 0x201   : > { %v968_v18 = vmul.f32 %v855_v12, %v2932_v26  ;;  %v992_v19 = vmul.f32 %v855_v12, %v3019_v56  ;;  %v1822_v22 = vpop.f32.mrb[10].mxu0 }
 0x202   : > { %v985_v23 = vadd.f32 %v977_v16, %v969_v14  ;;  %v1009_v24 = vsub.f32 %v993_v15, %v1001_v17  ;;  %v858_v25 = vsub.f32 %v1734_v2, %v1822_v22  ;;  %v1866_v27 = vpop.f32.mrb[2].mxu1  ;;  %v826_v28 = vpop.f32.mrb[11].mxu0 }
 0x203   : > { %v984_v29 = vadd.f32 %v976_v20, %v968_v18  ;;  %v1008_v30 = vsub.f32 %v992_v19, %v1000_v21  ;;  %v979_v57 = vmul.f32 %v1866_v27, %v3050_v59  ;;  %v939_v31 = vpop.f32.mrb[3].mxu1  ;;  %v1003_v33 = vmul.f32 %v1866_v27, %v2982_v51 }
 0x204   : > { %v971_v49 = vmul.f32 %v858_v25, %v2982_v51  ;;  %v995_v32 = vmul.f32 %v858_v25, %v3050_v59  ;;  %v857_v56 = vsub.f32 %v616_v3, %v826_v28  ;;  %v978_v26 = vmul.f32 %v939_v31, %v3044_v58 }
 0x205   : > { %v1002_v34 = vmul.f32 %v939_v31, %v2977_v50  ;;  %v1825_v35 = vpop.f32.mrb[12].mxu0  ;;  %1905 = vmatprep.mubr.f32.mxu0 %v984_v29  ;;  %1949 = vmatprep.mubr.f32.mxu1 %v1008_v30 }
 0x206   : > { %v987_v36 = vadd.f32 %v979_v57, %v971_v49  ;;  %v1011_v37 = vsub.f32 %v995_v32, %v1003_v33  ;;  %v970_v38 = vmul.f32 %v857_v56, %v2977_v50  ;;  %v994_v39 = vmul.f32 %v857_v56, %v3044_v58  ;;  %v1869_v40 = vpop.f32.mrb[4].mxu1  ;;  %v836_v41 = vpop.f32.mrb[13].mxu0  ;;  %1906 = vmatmul.mubr.f32.vlgmr.msra.gmra.mrb[16].mxu0 %v985_v23 }
 0x207   : > { %v860_v59 = vsub.f32 %v1737_v4, %v1825_v35  ;;  %v981_v51 = vmul.f32 %v1869_v40, %v3060_v61  ;;  %v1005_v42 = vmul.f32 %v1869_v40, %v2996_v53  ;;  %v859_v43 = vsub.f32 %v626_v5, %v836_v41  ;;  %v949_v44 = vpop.f32.mrb[5].mxu1  ;;  %1950 = vmatmul.mubr.f32.vlgmr.msra.gmra.mrb[8].mxu1 %v1009_v24 }
 0x208   : > { %v986_v45 = vadd.f32 %v978_v26, %v970_v38  ;;  %v1010_v46 = vsub.f32 %v994_v39, %v1002_v34  ;;  %v980_v47 = vmul.f32 %v949_v44, %v3054_v60  ;;  %v1004_v48 = vmul.f32 %v949_v44, %v2991_v52 }
 0x209   : > { %v973_v50 = vmul.f32 %v860_v59, %v2996_v53  ;;  %v997_v58 = vmul.f32 %v860_v59, %v3060_v61  ;;  %v972_v0 = vmul.f32 %v859_v43, %v2991_v52  ;;  %v996_v1 = vmul.f32 %v859_v43, %v3054_v60  ;;  %v1828_v2 = vpop.f32.mrb[14].mxu0 }
 0x20a   : > { %v862_v3 = vsub.f32 %v1740_v6, %v1828_v2  ;;  %v1872_v4 = vpop.f32.mrb[6].mxu1  ;;  %1908 = vmatprep.mubr.f32.mxu0 %v986_v45  ;;  %1952 = vmatprep.mubr.f32.mxu1 %v1010_v46  ;;  %v846_v5 = vpop.f32.mrb[15].mxu0 }
 0x20b   : > { %v989_v8 = vadd.f32 %v981_v51, %v973_v50  ;;  %v1013_v9 = vsub.f32 %v997_v58, %v1005_v42  ;;  %v988_v10 = vadd.f32 %v980_v47, %v972_v0  ;;  %v1012_v11 = vsub.f32 %v996_v1, %v1004_v48  ;;  %v959_v12 = vpop.f32.mrb[7].mxu1  ;;  %1909 = vmatmul.mubr.f32.gmra.mrb[18].mxu0 %v987_v36 }
 0x20c   : > { %v975_v53 = vmul.f32 %v862_v3, %v3010_v55  ;;  %v999_v61 = vmul.f32 %v862_v3, %v3070_v63  ;;  %v983_v52 = vmul.f32 %v1872_v4, %v3070_v63  ;;  %v1007_v60 = vmul.f32 %v1872_v4, %v3010_v55  ;;  %1953 = vmatmul.mubr.f32.gmra.mrb[10].mxu1 %v1011_v37 }
 0x20d   : > { %v861_v6 = vsub.f32 %v3075_v7, %v846_v5  ;;  %1911 = vmatprep.mubr.f32.mxu0 %v988_v10  ;;  %1955 = vmatprep.mubr.f32.mxu1 %v1012_v11  ;;  %v982_v17 = vmul.f32 %v959_v12, %v3064_v62  ;;  %v1006_v18 = vmul.f32 %v959_v12, %v3005_v54  ;;  %v1531_v7 = vld [vmem:[%s3252_s6] ss:$0 sm:$0xff] }
 0x20e   : > { %v991_v13 = vadd.f32 %v983_v52, %v975_v53  ;;  %v1015_v14 = vsub.f32 %v999_v61, %v1007_v60 }
 0x20f   : > { %v974_v15 = vmul.f32 %v861_v6, %v3005_v54  ;;  %v998_v16 = vmul.f32 %v861_v6, %v3064_v62  ;;  %1912 = vmatmul.mubr.f32.gmra.mrb[20].mxu0 %v989_v8  ;;  %v1532_v62 = vld [vmem:[%s3253_s7] ss:$0 sm:$0xff] }
 0x210   : > { %1956 = vmatmul.mubr.f32.gmra.mrb[12].mxu1 %v1013_v9 }
 0x211   : > { %v990_v63 = vadd.f32 %v982_v17, %v974_v15  ;;  %v1014_v55 = vsub.f32 %v998_v16, %v1006_v18 }
 0x213   : > { %1914 = vmatprep.mubr.f32.mxu0 %v990_v63  ;;  %1958 = vmatprep.mubr.f32.mxu1 %v1014_v55 }
 0x214   : > { %1915 = vmatmul.mubr.f32.gmra.mrb[22].mxu0 %v991_v13  ;;  %1959 = vmatmul.mubr.f32.gmra.mrb[14].mxu1 %v1015_v14 }
 0x2d9   : > { %v1907_v19 = vpop.f32.mrb[16].mxu0 }
 0x2da   : > { %v1127_v54 = vadd.f32 %v1907_v19, %v1531_v7  ;;  %v1951_v20 = vpop.f32.mrb[8].mxu1  ;;  %v1121_v21 = vpop.f32.mrb[17].mxu0 }
 0x2db   : > { %v1247_v22 = vadd.f32 %v1951_v20, %v1532_v62  ;;  %v1122_v23 = vadd.f32 %v1531_v7, %v1121_v21  ;;  %v1241_v24 = vpop.f32.mrb[9].mxu1 }
 0x2dc   : > { %1161 = vst [vmem:[%s3117_s15 + $0x8] sm:$0xff] %v1127_v54  ;;  %v1242_v25 = vadd.f32 %v1532_v62, %v1241_v24 }
 0x2dd   : > { %1281 = vst [vmem:[%s3121_s17 + $0x8] sm:$0xff] %v1247_v22  ;;  %1160 = vst [vmem:[%s3117_s15] sm:$0xff] %v1122_v23 }
 0x2de   : > { %1280 = vst [vmem:[%s3121_s17] sm:$0xff] %v1242_v25  ;;  %v1910_v27 = vpop.f32.mrb[18].mxu0 }
 0x2df   : > { %v1137_v28 = vadd.f32 %v1910_v27, %v1531_v7  ;;  %v1954_v29 = vpop.f32.mrb[10].mxu1  ;;  %v1131_v30 = vpop.f32.mrb[19].mxu0 }
 0x2e0   : > { %v1257_v57 = vadd.f32 %v1954_v29, %v1532_v62  ;;  %v1132_v31 = vadd.f32 %v1531_v7, %v1131_v30  ;;  %v1251_v49 = vpop.f32.mrb[11].mxu1 }
 0x2e1   : > { %1163 = vst [vmem:[%s3117_s15 + $0x18] sm:$0xff] %v1137_v28  ;;  %v1252_v32 = vadd.f32 %v1532_v62, %v1251_v49 }
 0x2e2   : > { %1283 = vst [vmem:[%s3121_s17 + $0x18] sm:$0xff] %v1257_v57  ;;  %1162 = vst [vmem:[%s3117_s15 + $0x10] sm:$0xff] %v1132_v31  ;;  %v1913_v33 = vpop.f32.mrb[20].mxu0 }
 0x2e3   : > { %1282 = vst [vmem:[%s3121_s17 + $0x10] sm:$0xff] %v1252_v32  ;;  %v1147_v56 = vadd.f32 %v1913_v33, %v1531_v7  ;;  %v1957_v26 = vpop.f32.mrb[12].mxu1  ;;  %v1141_v34 = vpop.f32.mrb[21].mxu0 }
 0x2e4   : > { %v1267_v35 = vadd.f32 %v1957_v26, %v1532_v62  ;;  %v1142_v36 = vadd.f32 %v1531_v7, %v1141_v34  ;;  %v1261_v37 = vpop.f32.mrb[13].mxu1 }
 0x2e5   : > { %1165 = vst [vmem:[%s3117_s15 + $0x28] sm:$0xff] %v1147_v56  ;;  %v1262_v38 = vadd.f32 %v1532_v62, %v1261_v37  ;;  %1300 = sbr.rel (!%p3293_p7) target bundleno = 777 (0x309), region = 80 }
 0x2e6   : > { %1285 = vst [vmem:[%s3121_s17 + $0x28] sm:$0xff] %v1267_v35  ;;  %1164 = vst [vmem:[%s3117_s15 + $0x20] sm:$0xff] %v1142_v36 }
 0x2e7   : > { %1284 = vst [vmem:[%s3121_s17 + $0x20] sm:$0xff] %v1262_v38  ;;  %v1916_v39 = vpop.f32.mrb[22].mxu0  ;;  %v1960_v40 = vpop.f32.mrb[14].mxu1 }
 0x2e8   : > { %v1157_v41 = vadd.f32 %v1916_v39, %v1531_v7  ;;  %v1277_v59 = vadd.f32 %v1960_v40, %v1532_v62  ;;  %v1151_v51 = vpop.f32.mrb[23].mxu0  ;;  %v1271_v42 = vpop.f32.mrb[15].mxu1 }
 0x2e9   : > { %v1152_v43 = vadd.f32 %v1531_v7, %v1151_v51  ;;  %v1272_v44 = vadd.f32 %v1532_v62, %v1271_v42 }
 0x2ea   : > { %1167 = vst [vmem:[%s3117_s15 + $0x38] sm:$0xff] %v1157_v41  ;;  %1287 = vst [vmem:[%s3121_s17 + $0x38] sm:$0xff] %v1277_v59 }
 0x2eb   : > { %1166 = vst [vmem:[%s3117_s15 + $0x30] sm:$0xff] %v1152_v43  ;;  %1286 = vst [vmem:[%s3121_s17 + $0x30] sm:$0xff] %v1272_v44 }
 0x2ec   : > { %s3311_s3 = smov (!%p1303_p8, %s1302_s3), 8 }
 0x2ed   : > { %s3143_s9 = sshll.u32 %s3311_s3, 7 }
 0x2ee   : > { %s1307_s19 = ssub.s32 1024, %s3143_s9 }
 0x2ef   : > { %1308 = vsyncadd %s1289_s25, %s1307_s19  ;;  %p1537_p9 = scmp.ne.s32.totalorder %s3143_s9, 0  ;;  %s1551_s27 = sshll.u32 %s2629_s13, 10 }
 0x2f0   : > { %s3294_s23 = sld [smem:[#allocation29_spill]]  ;;  %s1313_s26 = sshll.u32 %s3117_s15, 4  ;;  %s3156_s26 = int_to_ptr.vmem [resolvable:$true] %s1313_s26 }
 0x2f1   : > { %s2424_s20 = scalar_lea.vmem %s3156_s26, %s3143_s9  ;;  %s2552_s29 = smov [#allocation13]  }
 0x2f2   : > { %p2425_p1 = scmp.ne.s32.totalorder %s3156_s26, %s2424_s20  ;;  %s2428_s21 = sshll.u32 %s2552_s29, 4  ;;  %s2429_s21 = int_to_ptr.vmem [resolvable:$false] %s2428_s21 }
 0x2f3   : > { %s2430_s30 = scalar_lea.vmem %s2429_s21, 2048  ;;  %p2431_p5 = scmp.lt.s32.totalorder %s3156_s26, %s2429_s21 }
 0x2f4   : > { %p2426_p3 = pnand %p2425_p1, %p1537_p9  ;;  %p2432_p2 = scmp.lt.s32.totalorder %s2430_s30, %s2424_s20 }
 0x2f6   : > { %s3153_s24 = scalar_lea.hbm %s3294_s23, %s1551_s27  ;;  %p2427_p10 = pneg %p2426_p3 }
 0x2f7   : > { %p2433_p6 = por %p2432_p2, %p2431_p5 }
 0x2f9   : > { %p2434_p11 = pnand %p2433_p6, %p2427_p10 }
 0x2fb   : > { %2437 = shalt.err (!%p2434_p11)
}
 0x2fc   : > { %s2438_s15 = scalar_lea.hbm %s3153_s24, %s3143_s9  ;;  %s2442_s3 = scalar_lea.hbm %s3294_s23, 1920 }
 0x2fd   : > { %p2439_p13 = scmp.ne.s32.totalorder %s3153_s24, %s2438_s15  ;;  %p2443_p7 = scmp.lt.u32.totalorder %s3153_s24, %s3294_s23 }
 0x2fe   : > { %p2444_p8 = scmp.lt.u32.totalorder %s2442_s3, %s2438_s15  ;;  %p2446_p3 = scmp.lt.u32.totalorder %s2438_s15, %s3153_s24 }
 0x2ff   : > { %p2440_p0 = pnand %p2439_p13, %p1537_p9 }
 0x300   : > { %p2445_p1 = por %p2444_p8, %p2443_p7 }
 0x301   : > { %p2441_p12 = pneg %p2440_p0 }
 0x302   : > { %p2447_p10 = por %p2446_p3, %p2445_p1 }
 0x304   : > { %p2448_p5 = pnand %p2447_p10, %p2441_p12 }
 0x306   : > { %2451 = shalt.err (!%p2448_p5)
}
 0x307   : > { %s2553_s18 = smov 128   ;;  %s2554_s16 = smov 8  }
 0x308   : > { %1319 = dma.vmem_to_hbm [thread:$0]  (%p1537_p9), %s3156_s26, %s3143_s9, %s3153_s24, %s1289_s25, %s2553_s18, %s2553_s18, %s2554_s16  }
 0x309 PF: > { %s3295_s20 = sld [smem:[#allocation26_spill]] }
 0x30f   : > { %p3296_p2 = scmp.ne.s32.totalorder %s3295_s20, 0 }
 0x310   : > { %s1541_s29 = sshll.u32 (%p3296_p2), %s2629_s13, 3 }
 0x311   : > { %1322 = sbr.rel (!%p3296_p2) target bundleno = 821 (0x335), region = 84  ;;  %s1324_s21 = ssub.s32 (%p3296_p2), 15, %s1541_s29 }
 0x312   : > { %p1325_p6 = scmp.lt.s32.totalorder (%p3296_p2), %s1324_s21, 8 }
 0x318   : > { %s3313_s21 = smov (!%p1325_p6, %s1324_s21), 8 }
 0x319   : > { %s3187_s30 = sshll.u32 %s3313_s21, 7 }
 0x31a   : > { %s1329_s15 = ssub.s32 1024, %s3187_s30 }
 0x31b   : > { %1330 = vsyncadd %s1294_s8, %s1329_s15  ;;  %p1543_p9 = scmp.ne.s32.totalorder %s3187_s30, 0  ;;  %s1552_s25 = sshll.u32 %s2629_s13, 10 }
 0x31c   : > { %s3297_s26 = sld [smem:[#allocation30_spill]]  ;;  %s1335_s28 = sshll.u32 %s3121_s17, 4  ;;  %s3200_s28 = int_to_ptr.vmem [resolvable:$true] %s1335_s28 }
 0x31d   : > { %s2452_s3 = scalar_lea.vmem %s3200_s28, %s3187_s30  ;;  %s2555_s19 = smov [#allocation14]  }
 0x31e   : > { %p2453_p11 = scmp.ne.s32.totalorder %s3200_s28, %s2452_s3  ;;  %s2456_s27 = sshll.u32 %s2555_s19, 4  ;;  %s2457_s27 = int_to_ptr.vmem [resolvable:$false] %s2456_s27 }
 0x31f   : > { %s2458_s13 = scalar_lea.vmem %s2457_s27, 2048  ;;  %p2459_p12 = scmp.lt.s32.totalorder %s3200_s28, %s2457_s27 }
 0x320   : > { %p2454_p13 = pnand %p2453_p11, %p1543_p9  ;;  %p2460_p7 = scmp.lt.s32.totalorder %s2458_s13, %s2452_s3 }
 0x322   : > { %s3197_s22 = scalar_lea.hbm %s3297_s26, %s1552_s25  ;;  %p2455_p0 = pneg %p2454_p13 }
 0x323   : > { %p2461_p8 = por %p2460_p7, %p2459_p12 }
 0x325   : > { %p2462_p1 = pnand %p2461_p8, %p2455_p0 }
 0x327   : > { %2465 = shalt.err (!%p2462_p1)
}
 0x328   : > { %s2466_s17 = scalar_lea.hbm %s3197_s22, %s3187_s30  ;;  %s2470_s20 = scalar_lea.hbm %s3297_s26, 1920 }
 0x329   : > { %p2467_p3 = scmp.ne.s32.totalorder %s3197_s22, %s2466_s17  ;;  %p2471_p2 = scmp.lt.u32.totalorder %s3197_s22, %s3297_s26 }
 0x32a   : > { %p2472_p6 = scmp.lt.u32.totalorder %s2470_s20, %s2466_s17  ;;  %p2474_p13 = scmp.lt.u32.totalorder %s2466_s17, %s3197_s22 }
 0x32b   : > { %p2468_p10 = pnand %p2467_p3, %p1543_p9 }
 0x32c   : > { %p2473_p11 = por %p2472_p6, %p2471_p2 }
 0x32d   : > { %p2469_p5 = pneg %p2468_p10 }
 0x32e   : > { %p2475_p0 = por %p2474_p13, %p2473_p11 }
 0x330   : > { %p2476_p12 = pnand %p2475_p0, %p2469_p5 }
 0x332   : > { %2479 = shalt.err (!%p2476_p12)
}
 0x333   : > { %s2556_s15 = smov 128   ;;  %s2557_s25 = smov 8  }
 0x334   : > { %1341 = dma.vmem_to_hbm [thread:$0]  (%p1543_p9), %s3200_s28, %s3187_s30, %s3197_s22, %s1294_s8, %s2556_s15, %s2556_s15, %s2557_s25  }
 0x335 PF: > { %s3298_s9 = sld [smem:[#allocation23_spill]]  ;;  %s3299_s24 = sld [smem:[#allocation27_spill]] }
 0x33b   : > { %s1350_s3 = sand.u32 1, %s3298_s9   ;;  %p3300_p7 = scmp.ne.s32.totalorder %s3299_s24, 0 }
 0x33c   : > { %s1351_s19 = scalar_lea.sflag [#allocation4], %s1350_s3 }
 0x33d   : > { %p2195_p8 = pnand %p1507_p4, %p3300_p7 }
 0x33f   : > { %2517 = dma.done.wait (!%p2195_p8), %s1351_s19, 1024  }
 0x340   : > { %2519 = vsyncadd (!%p2195_p8), %s1351_s19, 4294966272  ;;  %s1360_s27 = scalar_lea.sflag [#allocation15], %s1350_s3 }
 0x341   : > { %2521 = dma.done.wait (!%p2195_p8), %s1360_s27, 1024  }
 0x342   : > { %2523 = vsyncadd (!%p2195_p8), %s1360_s27, 4294966272  ;;  %s3301_s12 = sld [smem:[#allocation24_spill]]  ;;  %s3302_s14 = sld [smem:[#allocation25_spill]] }
 0x343   : > { %s3303_s30 = smov %s2530_s10  ;;  %s3304_s10 = smov %s2534_s11 }
 0x348   : > { %p31_p9 = scmp.ge.s32.totalorder %s3301_s12, 4   ;;  %s3305_s11 = smov %s3302_s14 }
 0x34a   :  { %33 = sbr.rel (!%p31_p9) target bundleno = 15 (0xf), region = 143 }
 0x351   :  { %1365 = vsyncpa [#allocation3], 1 }
 0x352   :  { %1367 = vsyncpa [#allocation3 + $0x1], 1 }
 0x353   :  { %1368 = vsyncpa [#allocation6], 1 }
 0x354   :  { %1370 = vsyncpa [#allocation6 + $0x1], 1 }
 0x355   :  { %1371 = vsyncpa [#allocation9], 1 }
 0x356   :  { %1372 = vsyncpa [#allocation12], 1 }
 0x357   :  { %1373 = vsyncpa [#allocation4], 1 }
 0x358   :  { %1375 = vsyncpa [#allocation4 + $0x1], 1 }
 0x359   :  { %1376 = vsyncpa [#allocation15], 1 }
 0x35a   :  { %1378 = vsyncpa [#allocation15 + $0x1], 1 }

</bundles_post_ra>
